<compile_context>
chip_gen: v6e
topology: v6e:2x2x1
jax: 0.10.0
libtpu: 0.0.40
codegen_flags: <defaults>
</compile_context>

<pallas_src>
import math
from functools import partial

import jax
import jax.numpy as jnp
from jax.experimental import pallas as pl
from jax.experimental.pallas import tpu as pltpu

_LANE = 128
_TR_MAX = 1024                     # max rows per tile (f32: 512 KiB per block)
_LOG_CLAMP = -100.0                # PyTorch nn.BCELoss clamps log terms at -100
_VMEM_BUDGET = 24 * 1024 * 1024    # budget for double-buffered input blocks


def _cdiv(a, b):
    return -(-a // b)


def _round_up(x, m):
    return _cdiv(x, m) * m


def _sublane_granule(dtype):
    """Native row granule: 8 rows for 32-bit, 16 for 16-bit, 32 for 8-bit dtypes."""
    itemsize = jnp.dtype(dtype).itemsize
    return 8 * max(1, 4 // max(1, itemsize))


def _make_kernel(n_edges, tr, n_elem, binary_mask, needs_mask):
    """Kernel over one (tr, 128) row tile; all E edges handled in the same grid step."""

    def kernel(mask_ref, *rest):
        edge_refs = rest[:n_edges]
        out_ref = rest[n_edges]                      # (1, 1, 128) per-tile partial block

        m = mask_ref[...].astype(jnp.float32)        # (tr, 128), DMA'd once, reused E times

        total = jnp.zeros((tr, _LANE), jnp.float32)
        for e_ref in edge_refs:                      # E is small & static -> unrolled
            p = e_ref[...].astype(jnp.float32)
            if binary_mask:
                # mask in {0,1}: one EUP log per element instead of two.
                q = jnp.where(m >= 0.5, p, 1.0 - p)
                total = total + jnp.maximum(jnp.log(q), _LOG_CLAMP)
            else:
                log_p = jnp.maximum(jnp.log(p), _LOG_CLAMP)
                log_1mp = jnp.maximum(jnp.log(1.0 - p), _LOG_CLAMP)
                total = total + (m * log_p + (1.0 - m) * log_1mp)

        if needs_mask:
            # Zero out the ragged tail / partial-last-block garbage (select, so any
            # NaN/Inf produced from uninitialized OOB rows is discarded, not propagated).
            row = jax.lax.broadcasted_iota(jnp.int32, (tr, _LANE), 0)
            lane = jax.lax.broadcasted_iota(jnp.int32, (tr, _LANE), 1)
            idx = pl.program_id(0) * (tr * _LANE) + row * _LANE + lane
            total = jnp.where(idx < n_elem, total, 0.0)

        # Single cheap sublane reduce per tile -> lane-dense (1, 128) partial.
        out_ref[0] = -jnp.sum(total, axis=0, keepdims=True)

    return kernel


def _to_slab(x, r_full):
    """View x as a (r_full, 128) lane-dense slab.

    Free (pure reshape) when n_elem % 128 == 0; otherwise pads < 128 trailing zeros.
    Zero padding contributes exactly 0 to BCE (m=0, p=0) and is additionally masked
    inside the kernel.
    """
    flat = x.reshape(-1)
    total = r_full * _LANE
    if flat.shape[0] != total:
        # TODO(synk): rare path (n_elem % 128 != 0) still costs one copy of the array.
        flat = jnp.pad(flat, (0, total - flat.shape[0]))
    return flat.reshape(r_full, _LANE)


def _dimension_semantics(n_tiles):
    """Engage both TensorCores on v7x; plain 'parallel' elsewhere."""
    try:
        kind = jax.devices()[0].device_kind.lower()
    except Exception:
        kind = ""
    if "v7" in kind and n_tiles >= 2 and hasattr(pltpu, "CORE_PARALLEL"):
        return (pltpu.CORE_PARALLEL,)
    return ("parallel",)


@partial(jax.jit, static_argnames=("binary_mask",))
def edge_loss(edges, mask, binary_mask=False):
    """JAX/Pallas equivalent of Edge_loss.forward(edges, mask) -> scalar float32.

    binary_mask=True enables the single-log fast path (exact only for masks in {0,1}).
    """
    edges = list(edges)
    n_edges = len(edges)
    n_elem = int(math.prod(mask.shape))              # mean denominator per edge

    granule = max([_sublane_granule(mask.dtype)]
                  + [_sublane_granule(e.dtype) for e in edges])
    r_full = _cdiv(n_elem, _LANE)                    # rows of the lane-dense slab

    # Rows per tile: as large as possible under the VMEM budget (double-buffered inputs).
    bytes_per_row = (1 + n_edges) * 2 * _LANE * 4
    tr_max = max(granule,
                 min(_TR_MAX, (_VMEM_BUDGET // bytes_per_row) // granule * granule))

    n_tiles = _cdiv(r_full, tr_max)
    if n_tiles < 2 and r_full >= 2 * granule:
        n_tiles = 2                                  # pipeline depth / v7x core balance
    if n_tiles == 1:
        tr = r_full                                  # block == full array: always legal
    else:
        tr = _round_up(_cdiv(r_full, n_tiles), granule)
        n_tiles = _cdiv(r_full, tr)

    needs_mask = (n_tiles * tr * _LANE != n_elem)

    mask2d = _to_slab(mask, r_full)                  # (r_full, 128), native dtype
    edge_slabs = [_to_slab(e, r_full) for e in edges]

    tile_spec = pl.BlockSpec((tr, _LANE), lambda r: (r, 0))

    cost = pl.CostEstimate(
        flops=(3 if binary_mask else 5) * n_edges * n_elem,
        transcendentals=(1 if binary_mask else 2) * n_edges * n_elem,
        bytes_accessed=n_elem * (mask.dtype.itemsize
                                 + sum(e.dtype.itemsize for e in edges))
        + n_tiles * _LANE * 4,
    )

    partials = pl.pallas_call(
        _make_kernel(n_edges, tr, n_elem, binary_mask, needs_mask),
        out_shape=jax.ShapeDtypeStruct((n_tiles, 1, _LANE), jnp.float32),
        grid=(n_tiles,),
        in_specs=[tile_spec] * (1 + n_edges),        # mask + E edges, same tiling
        out_specs=pl.BlockSpec((1, 1, _LANE), lambda r: (r, 0, 0)),
        compiler_params=pltpu.CompilerParams(
            dimension_semantics=_dimension_semantics(n_tiles),
            vmem_limit_bytes=32 * 1024 * 1024,
        ),
        cost_estimate=cost,
    )(mask2d, *edge_slabs)

    # Tiny final reduction (fused under the same jit); sum over edges == total / n_elem.
    return jnp.sum(partials) / jnp.float32(n_elem)


def _reference_edge_loss(edges, mask):
    """Pure-JAX reference mirroring nn.BCELoss(reduction='mean') summed over edges."""
    total = jnp.float32(0.0)
    m = mask.astype(jnp.float32)
    for e in edges:
        p = e.astype(jnp.float32)
        log_p = jnp.maximum(jnp.log(p), _LOG_CLAMP)
        log_1mp = jnp.maximum(jnp.log(1.0 - p), _LOG_CLAMP)
        total = total + jnp.mean(-(m * log_p + (1.0 - m) * log_1mp))
    return total


if __name__ == "__main__":
    key = jax.random.PRNGKey(0)
    keys = jax.random.split(key, 16)

    # ---- Test 1: aligned case (n_elem % 128 == 0), 3 f32 edges -------------------------
    B, C, H, W = 2, 1, 16, 16
    n_edges = 3
    edges1 = [jax.random.uniform(keys[i], (B, C, H, W), jnp.float32, 0.01, 0.99)
              for i in range(n_edges)]
    mask1 = (jax.random.uniform(keys[3], (B, C, H, W)) > 0.5).astype(jnp.float32)

    loss1 = edge_loss(edges1, mask1)
    jax.block_until_ready(loss1)
    ref1 = _reference_edge_loss(edges1, mask1)
    assert jnp.allclose(loss1, ref1, rtol=1e-4, atol=1e-5), (loss1, ref1)

    # Binary-mask single-log fast path (exact for {0,1} masks).
    loss1b = edge_loss(edges1, mask1, binary_mask=True)
    jax.block_until_ready(loss1b)
    assert jnp.allclose(loss1b, ref1, rtol=1e-4, atol=1e-5), (loss1b, ref1)

    # ---- Test 2: ragged case (n_elem % 128 != 0) -> in-kernel tail masking -------------
    edges2 = [jax.random.uniform(keys[4 + i], (2, 1, 20, 20), jnp.float32, 0.01, 0.99)
              for i in range(2)]
    mask2 = (jax.random.uniform(keys[6], (2, 1, 20, 20)) > 0.5).astype(jnp.float32)
    loss2 = edge_loss(edges2, mask2)
    jax.block_until_ready(loss2)
    ref2 = _reference_edge_loss(edges2, mask2)
    assert jnp.allclose(loss2, ref2, rtol=1e-4, atol=1e-5), (loss2, ref2)

    # ---- Test 3: multi-tile with partial last block + mixed dtype (bf16 edge) ----------
    e3a = jax.random.uniform(keys[7], (2, 1, 48, 48), jnp.float32, 0.01, 0.99)
    e3b = jax.random.uniform(keys[8], (2, 1, 48, 48), jnp.float32, 0.01, 0.99
                             ).astype(jnp.bfloat16)
    mask3 = (jax.random.uniform(keys[9], (2, 1, 48, 48)) > 0.5).astype(jnp.float32)
    loss3 = edge_loss([e3a, e3b], mask3)
    jax.block_until_ready(loss3)
    ref3 = _reference_edge_loss([e3a, e3b], mask3)
    assert jnp.allclose(loss3, ref3, rtol=1e-4, atol=1e-5), (loss3, ref3)

    print("KERNEL_OK")
</pallas_src>

<mosaic_0001>
module attributes {stable_mosaic.version = 11 : i64} {
  func.func @kernel(%arg0: i32, %arg1: memref<4x128xf32, #tpu.memory_space<vmem>>, %arg2: memref<4x128xf32, #tpu.memory_space<vmem>>, %arg3: memref<4x128xf32, #tpu.memory_space<vmem>>, %arg4: memref<4x128xf32, #tpu.memory_space<vmem>>, %arg5: memref<1x1x128xf32, #tpu.memory_space<vmem>>) attributes {dimension_semantics = [#tpu.dimension_semantics<parallel>], iteration_bounds = array<i64: 1>, scalar_prefetch = 0 : i64, scratch_operands = 0 : i64, tpu.core_type = #tpu.core_type<tc>, window_params = [{transform_indices = @transform_0, window_bounds = array<i64: 4, 128>}, {transform_indices = @transform_1, window_bounds = array<i64: 4, 128>}, {transform_indices = @transform_2, window_bounds = array<i64: 4, 128>}, {transform_indices = @transform_3, window_bounds = array<i64: 4, 128>}, {transform_indices = @transform_4, window_bounds = array<i64: 1, 1, 128>}]} {
    %c0 = arith.constant 0 : index
    %c0_0 = arith.constant 0 : index
    %0 = vector.load %arg1[%c0, %c0_0] : memref<4x128xf32, #tpu.memory_space<vmem>>, vector<4x128xf32>
    %cst = arith.constant 0.000000e+00 : f32
    %1 = vector.broadcast %cst : f32 to vector<4x128xf32>
    %c0_1 = arith.constant 0 : index
    %c0_2 = arith.constant 0 : index
    %2 = vector.load %arg2[%c0_1, %c0_2] : memref<4x128xf32, #tpu.memory_space<vmem>>, vector<4x128xf32>
    %3 = math.log %2 : vector<4x128xf32>
    %cst_3 = arith.constant -1.000000e+02 : f32
    %4 = vector.broadcast %cst_3 : f32 to vector<4x128xf32>
    %5 = arith.maximumf %3, %4 : vector<4x128xf32>
    %cst_4 = arith.constant 1.000000e+00 : f32
    %6 = vector.broadcast %cst_4 : f32 to vector<4x128xf32>
    %7 = arith.subf %6, %2 : vector<4x128xf32>
    %8 = math.log %7 : vector<4x128xf32>
    %cst_5 = arith.constant -1.000000e+02 : f32
    %9 = vector.broadcast %cst_5 : f32 to vector<4x128xf32>
    %10 = arith.maximumf %8, %9 : vector<4x128xf32>
    %11 = arith.mulf %0, %5 : vector<4x128xf32>
    %cst_6 = arith.constant 1.000000e+00 : f32
    %12 = vector.broadcast %cst_6 : f32 to vector<4x128xf32>
    %13 = arith.subf %12, %0 : vector<4x128xf32>
    %14 = arith.mulf %13, %10 : vector<4x128xf32>
    %15 = arith.addf %11, %14 : vector<4x128xf32>
    %16 = arith.addf %1, %15 : vector<4x128xf32>
    %c0_7 = arith.constant 0 : index
    %c0_8 = arith.constant 0 : index
    %17 = vector.load %arg3[%c0_7, %c0_8] : memref<4x128xf32, #tpu.memory_space<vmem>>, vector<4x128xf32>
    %18 = math.log %17 : vector<4x128xf32>
    %cst_9 = arith.constant -1.000000e+02 : f32
    %19 = vector.broadcast %cst_9 : f32 to vector<4x128xf32>
    %20 = arith.maximumf %18, %19 : vector<4x128xf32>
    %cst_10 = arith.constant 1.000000e+00 : f32
    %21 = vector.broadcast %cst_10 : f32 to vector<4x128xf32>
    %22 = arith.subf %21, %17 : vector<4x128xf32>
    %23 = math.log %22 : vector<4x128xf32>
    %cst_11 = arith.constant -1.000000e+02 : f32
    %24 = vector.broadcast %cst_11 : f32 to vector<4x128xf32>
    %25 = arith.maximumf %23, %24 : vector<4x128xf32>
    %26 = arith.mulf %0, %20 : vector<4x128xf32>
    %cst_12 = arith.constant 1.000000e+00 : f32
    %27 = vector.broadcast %cst_12 : f32 to vector<4x128xf32>
    %28 = arith.subf %27, %0 : vector<4x128xf32>
    %29 = arith.mulf %28, %25 : vector<4x128xf32>
    %30 = arith.addf %26, %29 : vector<4x128xf32>
    %31 = arith.addf %16, %30 : vector<4x128xf32>
    %c0_13 = arith.constant 0 : index
    %c0_14 = arith.constant 0 : index
    %32 = vector.load %arg4[%c0_13, %c0_14] : memref<4x128xf32, #tpu.memory_space<vmem>>, vector<4x128xf32>
    %33 = math.log %32 : vector<4x128xf32>
    %cst_15 = arith.constant -1.000000e+02 : f32
    %34 = vector.broadcast %cst_15 : f32 to vector<4x128xf32>
    %35 = arith.maximumf %33, %34 : vector<4x128xf32>
    %cst_16 = arith.constant 1.000000e+00 : f32
    %36 = vector.broadcast %cst_16 : f32 to vector<4x128xf32>
    %37 = arith.subf %36, %32 : vector<4x128xf32>
    %38 = math.log %37 : vector<4x128xf32>
    %cst_17 = arith.constant -1.000000e+02 : f32
    %39 = vector.broadcast %cst_17 : f32 to vector<4x128xf32>
    %40 = arith.maximumf %38, %39 : vector<4x128xf32>
    %41 = arith.mulf %0, %35 : vector<4x128xf32>
    %cst_18 = arith.constant 1.000000e+00 : f32
    %42 = vector.broadcast %cst_18 : f32 to vector<4x128xf32>
    %43 = arith.subf %42, %0 : vector<4x128xf32>
    %44 = arith.mulf %43, %40 : vector<4x128xf32>
    %45 = arith.addf %41, %44 : vector<4x128xf32>
    %46 = arith.addf %31, %45 : vector<4x128xf32>
    %cst_19 = arith.constant dense<0.000000e+00> : vector<128xf32>
    %47 = vector.multi_reduction <add>, %46, %cst_19 [0] : vector<4x128xf32> to vector<128xf32>
    %48 = vector.shape_cast %47 : vector<128xf32> to vector<1x128xf32>
    %cst_20 = arith.constant 0.000000e+00 : f32
    %49 = vector.broadcast %cst_20 : f32 to vector<1x128xf32>
    %50 = arith.subf %49, %48 : vector<1x128xf32>
    %c0_21 = arith.constant 0 : index
    %c0_22 = arith.constant 0 : index
    %c0_23 = arith.constant 0 : index
    %51 = vector.load %arg5[%c0_21, %c0_22, %c0_23] : memref<1x1x128xf32, #tpu.memory_space<vmem>>, vector<1x1x128xf32>
    %52 = vector.shape_cast %51 : vector<1x1x128xf32> to vector<1x128xf32>
    %53 = vector.shape_cast %50 : vector<1x128xf32> to vector<1x1x128xf32>
    tpu.vector_store %arg5[%c0_21, %c0_22, %c0_23], %53 {strides = array<i32>} : memref<1x1x128xf32, #tpu.memory_space<vmem>>, vector<1x1x128xf32>,
    return
  }
  func.func @transform_0(%arg0: i32) -> (i32, i32) {
    %c0_i32 = arith.constant 0 : i32
    %c0_i32_0 = arith.constant 0 : i32
    return %arg0, %c0_i32 : i32, i32
  }
  func.func @transform_1(%arg0: i32) -> (i32, i32) {
    %c0_i32 = arith.constant 0 : i32
    %c0_i32_0 = arith.constant 0 : i32
    return %arg0, %c0_i32 : i32, i32
  }
  func.func @transform_2(%arg0: i32) -> (i32, i32) {
    %c0_i32 = arith.constant 0 : i32
    %c0_i32_0 = arith.constant 0 : i32
    return %arg0, %c0_i32 : i32, i32
  }
  func.func @transform_3(%arg0: i32) -> (i32, i32) {
    %c0_i32 = arith.constant 0 : i32
    %c0_i32_0 = arith.constant 0 : i32
    return %arg0, %c0_i32 : i32, i32
  }
  func.func @transform_4(%arg0: i32) -> (i32, i32, i32) {
    %c0_i32 = arith.constant 0 : i32
    %c0_i32_0 = arith.constant 0 : i32
    %c0_i32_1 = arith.constant 0 : i32
    return %arg0, %c0_i32, %c0_i32_0 : i32, i32, i32
  }
}

</mosaic_0001>

<bundles_post_ra>
// kernel: edge_loss.1
= control target key start
LH: loop header
LB: loop body
LE: loop exit
PB: predicated region body
PF: predicated region fallthrough
CT: control target
= control target key end

     0   :  { %vm55_vm0 = vcmask 1043456   ;;  %s121_s1 = inlined_call_operand.vmem [shape: f32[4,128], index: 1, kind: input, shape index: {}]   ;;  %s122_s2 = inlined_call_operand.vmem [shape: f32[4,128], index: 2, kind: input, shape index: {}]   ;;  %s123_s3 = inlined_call_operand.vmem [shape: f32[4,128], index: 3, kind: input, shape index: {}]   ;;  %s124_s0 = inlined_call_operand.vmem [shape: f32[4,128], index: 0, kind: input, shape index: {}]   ;;  %s125_s4 = inlined_call_operand.vmem [shape: f32[1,1,128], index: 4, kind: output, shape index: {}]  }
   0x1   :  { %v18_v0 = vld [vmem:[%s121_s1] sm:$0xf] }
   0x2   :  { %v31_v1 = vld [vmem:[%s122_s2] sm:$0xf]  ;;  %69 = vlog2.f32 %v18_v0  ;;  %v22_v2 = vsub.f32 1.0, %v18_v0 }
   0x3   :  { %v35_v3 = vsub.f32 1.0, %v31_v1  ;;  %v43_v4 = vld [vmem:[%s123_s3] sm:$0xf]  ;;  %71 = vlog2.f32 %v31_v1 }
   0x4   :  { %v47_v5 = vsub.f32 1.0, %v43_v4  ;;  %73 = vlog2.f32 %v22_v2  ;;  %v17_v7 = vld [vmem:[%s124_s0] sm:$0xf] }
   0x5   :  { %75 = vlog2.f32 %v35_v3  ;;  %v27_v15 = vsub.f32 1.0, %v17_v7 }
   0x6   :  { %77 = vlog2.f32 %v43_v4 }
   0x7   :  { %79 = vlog2.f32 %v47_v5 }
   0xf   :  { %v70_v6 = vpop.eup %69 }
  0x10   :  { %v72_v8 = vpop.eup %71  ;;  %v20_v9 = vmul.f32 0.6931472, %v70_v6 }
  0x11   :  { %v74_v10 = vpop.eup %73  ;;  %v33_v11 = vmul.f32 0.6931472, %v72_v8 }
  0x12   :  { %v76_v12 = vpop.eup %75  ;;  %v21_v13 = vmax.f32 %v20_v9, -100.0  ;;  %v24_v14 = vmul.f32 0.6931472, %v74_v10 }
  0x13   :  { %v78_v16 = vpop.eup %77  ;;  %v34_v17 = vmax.f32 %v33_v11, -100.0  ;;  %v37_v18 = vmul.f32 0.6931472, %v76_v12 }
  0x14   :  { %v80_v19 = vpop.eup %79  ;;  %v25_v20 = vmax.f32 %v24_v14, -100.0  ;;  %v26_v21 = vmul.f32 %v21_v13, %v17_v7  ;;  %v45_v22 = vmul.f32 0.6931472, %v78_v16 }
  0x15   :  { %v38_v23 = vmax.f32 %v37_v18, -100.0  ;;  %v39_v24 = vmul.f32 %v34_v17, %v17_v7  ;;  %v49_v25 = vmul.f32 0.6931472, %v80_v19 }
  0x16   :  { %v28_v26 = vmul.f32 %v27_v15, %v25_v20  ;;  %v46_v27 = vmax.f32 %v45_v22, -100.0 }
  0x17   :  { %v40_v28 = vmul.f32 %v38_v23, %v27_v15  ;;  %v50_v29 = vmax.f32 %v49_v25, -100.0 }
  0x18   :  { %v29_v30 = vadd.f32 %v28_v26, %v26_v21  ;;  %v51_v31 = vmul.f32 %v46_v27, %v17_v7 }
  0x19   :  { %v41_v32 = vadd.f32 %v40_v28, %v39_v24  ;;  %v52_v33 = vmul.f32 %v50_v29, %v27_v15 }
  0x1b   :  { %v42_v34 = vadd.f32 %v41_v32, %v29_v30  ;;  %v53_v35 = vadd.f32 %v52_v33, %v51_v31 }
  0x1d   :  { %v54_v36 = vadd.f32 %v53_v35, %v42_v34 }
  0x1f   :  { %v56_v37 = vsel %vm55_vm0, %v54_v36, 0.0 }
  0x20   :  { %v57_v38 = vrot.slane %v56_v37, 4 }
  0x22   :  { %v58_v39 = vadd.f32 %v57_v38, %v56_v37 }
  0x24   :  { %v59_v40 = vrot.slane %v58_v39, 2 }
  0x26   :  { %v60_v41 = vadd.f32 %v59_v40, %v58_v39 }
  0x28   :  { %v61_v42 = vrot.slane %v60_v41, 1 }
  0x2a   :  { %v62_v43 = vadd.f32 %v61_v42, %v60_v41 }
  0x2c   :  { %v63_v44 = vsub.f32 0.0, %v62_v43 }
  0x2e   :  { %64 = vst [vmem:[%s125_s4] sm:$0x1] %v63_v44 }

</bundles_post_ra>
